<compile_context>
chip_gen: v6e
topology: v6e:2x2x1
jax: 0.10.0
libtpu: 0.0.40
codegen_flags: <defaults>
</compile_context>

<pallas_src>
import jax
import jax.numpy as jnp
from jax.experimental import pallas as pl
from jax.experimental.pallas import tpu as pltpu

LANE = 128          # TPU lane width
TILE_B_MAX = 512    # batch tile (sweet spot per measured tiled-op data)


def _round_up(x, m):
    return (x + m - 1) // m * m


def _pad2(a, rows, cols):
    r, c = a.shape
    return jnp.pad(a, ((0, rows - r), (0, cols - c)))


# ----------------------------- kernels ------------------------------------- #

def _linear_kernel(x_ref, w_ref, b_ref, o_ref):
    # layers == 1:  y = x @ W + b      (bf16 MXU inputs, f32 accumulation)
    y = jnp.dot(x_ref[...], w_ref[...], preferred_element_type=jnp.float32)
    o_ref[...] = (y + b_ref[...]).astype(o_ref.dtype)


def _mlp2_kernel(x_ref, w1_ref, b1_ref, w2_ref, b2_ref, o_ref):
    # layers == 2:  y = relu(x @ W1 + b1) @ W2 + b2
    h = jnp.dot(x_ref[...], w1_ref[...], preferred_element_type=jnp.float32)
    h = jnp.maximum(h + b1_ref[...], 0.0)            # f32 epilogue (v5e-safe)
    y = jnp.dot(h.astype(w2_ref.dtype), w2_ref[...],
                preferred_element_type=jnp.float32)
    o_ref[...] = (y + b2_ref[...]).astype(o_ref.dtype)


# ----------------------------- wrapper -------------------------------------- #

def prepare_params(params, layers, compute_dtype=jnp.bfloat16):
    """Pad weights/biases to lane-dense shapes and cast matmul weights to bf16.

    Do this ONCE outside the rollout hot loop. Padded lanes are zero so the
    math is unchanged.
    """
    prepped = {"layers": layers}
    if layers == 1:
        w1, b1 = params["w1"], params["b1"]
        n_in, n_out = w1.shape
        out_pad = _round_up(n_out, LANE)
        prepped["w1"] = _pad2(w1, n_in, out_pad).astype(compute_dtype)
        prepped["b1"] = _pad2(b1, 1, out_pad).astype(jnp.float32)
        prepped["n_out"] = n_out
    else:
        w1, b1, w2, b2 = params["w1"], params["b1"], params["w2"], params["b2"]
        n_in, hidden = w1.shape
        n_out = w2.shape[1]
        hid_pad = _round_up(hidden, LANE)
        out_pad = _round_up(n_out, LANE)
        prepped["w1"] = _pad2(w1, n_in, hid_pad).astype(compute_dtype)
        prepped["b1"] = _pad2(b1, 1, hid_pad).astype(jnp.float32)
        prepped["w2"] = _pad2(w2, hid_pad, out_pad).astype(compute_dtype)
        prepped["b2"] = _pad2(b2, 1, out_pad).astype(jnp.float32)
        prepped["n_out"] = n_out
    return prepped


def policy_forward(x, prepped):
    """Forward pass of Policy. x: [B, n_inputs] float32 -> [B, n_outputs] f32."""
    layers = prepped["layers"]
    n_out = prepped["n_out"]
    B, n_in = x.shape

    w1 = prepped["w1"]
    xk = x.astype(w1.dtype)

    # Batch tiling: 1-D grid, weights VMEM-resident, x/out double-buffered.
    tile_b = min(_round_up(max(B, 8), 8), TILE_B_MAX)
    b_pad = _round_up(B, tile_b)
    if b_pad != B:
        xk = jnp.pad(xk, ((0, b_pad - B), (0, 0)))
    grid = (b_pad // tile_b,)

    def batch_spec(feat):
        return pl.BlockSpec((tile_b, feat), lambda i: (i, 0))

    def resident_spec(shape):
        return pl.BlockSpec(shape, lambda i: (0, 0))

    cparams = pltpu.CompilerParams(dimension_semantics=("parallel",))
    itemsize = jnp.dtype(w1.dtype).itemsize

    if layers == 1:
        b1 = prepped["b1"]
        out_pad = w1.shape[1]
        flops = 2 * b_pad * n_in * out_pad
        bytes_acc = (xk.size * itemsize + w1.size * itemsize
                     + b1.size * 4 + b_pad * out_pad * 4)
        y = pl.pallas_call(
            _linear_kernel,
            out_shape=jax.ShapeDtypeStruct((b_pad, out_pad), jnp.float32),
            grid=grid,
            in_specs=[batch_spec(n_in),
                      resident_spec(w1.shape),
                      resident_spec(b1.shape)],
            out_specs=batch_spec(out_pad),
            compiler_params=cparams,
            cost_estimate=pl.CostEstimate(flops=flops, transcendentals=0,
                                          bytes_accessed=bytes_acc),
        )(xk, w1, b1)
    else:
        b1, w2, b2 = prepped["b1"], prepped["w2"], prepped["b2"]
        hid_pad = w1.shape[1]
        out_pad = w2.shape[1]
        flops = 2 * b_pad * (n_in * hid_pad + hid_pad * out_pad)
        bytes_acc = (xk.size * itemsize + (w1.size + w2.size) * itemsize
                     + (b1.size + b2.size) * 4 + b_pad * out_pad * 4)
        y = pl.pallas_call(
            _mlp2_kernel,
            out_shape=jax.ShapeDtypeStruct((b_pad, out_pad), jnp.float32),
            grid=grid,
            in_specs=[batch_spec(n_in),
                      resident_spec(w1.shape), resident_spec(b1.shape),
                      resident_spec(w2.shape), resident_spec(b2.shape)],
            out_specs=batch_spec(out_pad),
            compiler_params=cparams,
            cost_estimate=pl.CostEstimate(flops=flops, transcendentals=0,
                                          bytes_accessed=bytes_acc),
        )(xk, w1, b1, w2, b2)

    return y[:B, :n_out]


# ----------------------------- param init ----------------------------------- #

def init_policy_params(key, n_inputs, n_outputs, is_continuous, layers):
    """Init mirroring Policy.__init__ (xavier_normal weights, PyTorch-default
    uniform biases). Weights stored transposed: [in, out]."""
    params = {}
    if layers == 1:
        k1, k2 = jax.random.split(key, 2)
        std1 = (2.0 / (n_inputs + n_outputs)) ** 0.5
        params["w1"] = std1 * jax.random.normal(k1, (n_inputs, n_outputs), jnp.float32)
        bound1 = 1.0 / (n_inputs ** 0.5)
        params["b1"] = jax.random.uniform(k2, (1, n_outputs), jnp.float32,
                                          -bound1, bound1)
    else:
        hidden = 64
        k1, k2, k3, k4 = jax.random.split(key, 4)
        std1 = (2.0 / (n_inputs + hidden)) ** 0.5
        params["w1"] = std1 * jax.random.normal(k1, (n_inputs, hidden), jnp.float32)
        bound1 = 1.0 / (n_inputs ** 0.5)
        params["b1"] = jax.random.uniform(k2, (1, hidden), jnp.float32,
                                          -bound1, bound1)
        std2 = (2.0 / (hidden + n_outputs)) ** 0.5
        params["w2"] = std2 * jax.random.normal(k3, (hidden, n_outputs), jnp.float32)
        bound2 = 1.0 / (hidden ** 0.5)
        params["b2"] = jax.random.uniform(k4, (1, n_outputs), jnp.float32,
                                          -bound2, bound2)
    if is_continuous:
        # TODO(synk): log_std feeds torch.distributions sampling outside
        # forward(); kept as a parameter only (not part of this kernel).
        params["log_std"] = jnp.zeros((n_outputs,), jnp.float32)
    return params


# ----------------------------- references ----------------------------------- #

def policy_forward_ref(x, params, layers, compute_dtype=jnp.bfloat16):
    """Reference matching the kernel numerics (bf16 MXU inputs, f32 accum)."""
    if layers == 1:
        y = jnp.dot(x.astype(compute_dtype), params["w1"].astype(compute_dtype),
                    preferred_element_type=jnp.float32)
        return y + params["b1"]
    h = jnp.dot(x.astype(compute_dtype), params["w1"].astype(compute_dtype),
                preferred_element_type=jnp.float32) + params["b1"]
    h = jnp.maximum(h, 0.0)
    y = jnp.dot(h.astype(compute_dtype), params["w2"].astype(compute_dtype),
                preferred_element_type=jnp.float32) + params["b2"]
    return y


def policy_forward_ref_f32(x, params, layers):
    if layers == 1:
        return x @ params["w1"] + params["b1"]
    h = jnp.maximum(x @ params["w1"] + params["b1"], 0.0)
    return h @ params["w2"] + params["b2"]


# ----------------------------- main ----------------------------------------- #

if __name__ == "__main__":
    key = jax.random.PRNGKey(0)
    kx, kxb, kp1, kp2 = jax.random.split(key, 4)

    n_inputs, n_outputs = 32, 8

    # layers = 2 path (fc1 -> relu -> fc2), continuous policy, small batch.
    x = jax.random.normal(kx, (8, n_inputs), jnp.float32)
    params2 = init_policy_params(kp1, n_inputs, n_outputs,
                                 is_continuous=True, layers=2)
    prepped2 = prepare_params(params2, layers=2)
    out2 = policy_forward(x, prepped2)
    jax.block_until_ready(out2)
    assert out2.shape == (8, n_outputs)
    ref2 = policy_forward_ref(x, params2, layers=2)
    assert jnp.allclose(out2, ref2, atol=1e-3, rtol=1e-3)
    ref2_f32 = policy_forward_ref_f32(x, params2, layers=2)
    assert jnp.allclose(out2, ref2_f32, atol=5e-2, rtol=5e-2)

    # layers = 2 path, larger batch exercising multi-tile grid + batch padding.
    xb = jax.random.normal(kxb, (600, n_inputs), jnp.float32)
    outb = policy_forward(xb, prepped2)
    jax.block_until_ready(outb)
    assert outb.shape == (600, n_outputs)
    refb = policy_forward_ref(xb, params2, layers=2)
    assert jnp.allclose(outb, refb, atol=1e-3, rtol=1e-3)

    # layers = 1 path (single linear).
    params1 = init_policy_params(kp2, n_inputs, n_outputs,
                                 is_continuous=False, layers=1)
    prepped1 = prepare_params(params1, layers=1)
    out1 = policy_forward(x, prepped1)
    jax.block_until_ready(out1)
    assert out1.shape == (8, n_outputs)
    ref1 = policy_forward_ref(x, params1, layers=1)
    assert jnp.allclose(out1, ref1, atol=1e-3, rtol=1e-3)

    print("KERNEL_OK")
</pallas_src>

<mosaic_0001>
module attributes {stable_mosaic.version = 11 : i64} {
  func.func @_mlp2_kernel(%arg0: i32, %arg1: memref<8x32xbf16, #tpu.memory_space<vmem>>, %arg2: memref<32x128xbf16, #tpu.memory_space<vmem>>, %arg3: memref<1x128xf32, #tpu.memory_space<vmem>>, %arg4: memref<128x128xbf16, #tpu.memory_space<vmem>>, %arg5: memref<1x128xf32, #tpu.memory_space<vmem>>, %arg6: memref<8x128xf32, #tpu.memory_space<vmem>>) attributes {dimension_semantics = [#tpu.dimension_semantics<parallel>], iteration_bounds = array<i64: 1>, scalar_prefetch = 0 : i64, scratch_operands = 0 : i64, tpu.core_type = #tpu.core_type<tc>, window_params = [{transform_indices = @transform_0, window_bounds = array<i64: 8, 32>}, {pipeline_mode = #tpu.pipeline_mode<synchronous>, transform_indices = @transform_1, window_bounds = array<i64: 32, 128>}, {pipeline_mode = #tpu.pipeline_mode<synchronous>, transform_indices = @transform_2, window_bounds = array<i64: 1, 128>}, {pipeline_mode = #tpu.pipeline_mode<synchronous>, transform_indices = @transform_3, window_bounds = array<i64: 128, 128>}, {pipeline_mode = #tpu.pipeline_mode<synchronous>, transform_indices = @transform_4, window_bounds = array<i64: 1, 128>}, {transform_indices = @transform_5, window_bounds = array<i64: 8, 128>}]} {
    %c0 = arith.constant 0 : index
    %c0_0 = arith.constant 0 : index
    %0 = vector.load %arg1[%c0, %c0_0] : memref<8x32xbf16, #tpu.memory_space<vmem>>, vector<8x32xbf16>
    %c0_1 = arith.constant 0 : index
    %c0_2 = arith.constant 0 : index
    %1 = vector.load %arg2[%c0_1, %c0_2] : memref<32x128xbf16, #tpu.memory_space<vmem>>, vector<32x128xbf16>
    %cst = arith.constant dense<0.000000e+00> : vector<8x128xf32>
    %2 = tpu.matmul %0, %1, %cst {dimension_numbers = #tpu.dot_dimension_numbers<[1], [0], [0], [1], [0, 0, 1, 1], [], []>} : vector<8x32xbf16>, vector<32x128xbf16>, vector<8x128xf32> -> vector<8x128xf32>
    %c0_3 = arith.constant 0 : index
    %c0_4 = arith.constant 0 : index
    %3 = vector.load %arg3[%c0_3, %c0_4] : memref<1x128xf32, #tpu.memory_space<vmem>>, vector<1x128xf32>
    %4 = vector.broadcast %3 : vector<1x128xf32> to vector<8x128xf32>
    %5 = arith.addf %2, %4 : vector<8x128xf32>
    %cst_5 = arith.constant 0.000000e+00 : f32
    %6 = vector.broadcast %cst_5 : f32 to vector<8x128xf32>
    %7 = arith.maximumf %5, %6 : vector<8x128xf32>
    %8 = arith.truncf %7 : vector<8x128xf32> to vector<8x128xbf16>
    %c0_6 = arith.constant 0 : index
    %c0_7 = arith.constant 0 : index
    %9 = vector.load %arg4[%c0_6, %c0_7] : memref<128x128xbf16, #tpu.memory_space<vmem>>, vector<128x128xbf16>
    %cst_8 = arith.constant dense<0.000000e+00> : vector<8x128xf32>
    %10 = tpu.matmul %8, %9, %cst_8 {dimension_numbers = #tpu.dot_dimension_numbers<[1], [0], [0], [1], [0, 0, 1, 1], [], []>} : vector<8x128xbf16>, vector<128x128xbf16>, vector<8x128xf32> -> vector<8x128xf32>
    %c0_9 = arith.constant 0 : index
    %c0_10 = arith.constant 0 : index
    %11 = vector.load %arg5[%c0_9, %c0_10] : memref<1x128xf32, #tpu.memory_space<vmem>>, vector<1x128xf32>
    %12 = vector.broadcast %11 : vector<1x128xf32> to vector<8x128xf32>
    %13 = arith.addf %10, %12 : vector<8x128xf32>
    %c0_11 = arith.constant 0 : index
    %c0_12 = arith.constant 0 : index
    %14 = vector.load %arg6[%c0_11, %c0_12] : memref<8x128xf32, #tpu.memory_space<vmem>>, vector<8x128xf32>
    tpu.vector_store %arg6[%c0_11, %c0_12], %13 {strides = array<i32>} : memref<8x128xf32, #tpu.memory_space<vmem>>, vector<8x128xf32>,
    return
  }
  func.func @transform_0(%arg0: i32) -> (i32, i32) {
    %c0_i32 = arith.constant 0 : i32
    %c0_i32_0 = arith.constant 0 : i32
    return %arg0, %c0_i32 : i32, i32
  }
  func.func @transform_1(%arg0: i32) -> (i32, i32) {
    %c0_i32 = arith.constant 0 : i32
    %c0_i32_0 = arith.constant 0 : i32
    %c0_i32_1 = arith.constant 0 : i32
    return %c0_i32, %c0_i32_0 : i32, i32
  }
  func.func @transform_2(%arg0: i32) -> (i32, i32) {
    %c0_i32 = arith.constant 0 : i32
    %c0_i32_0 = arith.constant 0 : i32
    %c0_i32_1 = arith.constant 0 : i32
    return %c0_i32, %c0_i32_0 : i32, i32
  }
  func.func @transform_3(%arg0: i32) -> (i32, i32) {
    %c0_i32 = arith.constant 0 : i32
    %c0_i32_0 = arith.constant 0 : i32
    %c0_i32_1 = arith.constant 0 : i32
    return %c0_i32, %c0_i32_0 : i32, i32
  }
  func.func @transform_4(%arg0: i32) -> (i32, i32) {
    %c0_i32 = arith.constant 0 : i32
    %c0_i32_0 = arith.constant 0 : i32
    %c0_i32_1 = arith.constant 0 : i32
    return %c0_i32, %c0_i32_0 : i32, i32
  }
  func.func @transform_5(%arg0: i32) -> (i32, i32) {
    %c0_i32 = arith.constant 0 : i32
    %c0_i32_0 = arith.constant 0 : i32
    return %arg0, %c0_i32 : i32, i32
  }
}

</mosaic_0001>

<bundles_post_ra>
// kernel: tpu_custom_call.1
= control target key start
LH: loop header
LB: loop body
LE: loop exit
PB: predicated region body
PF: predicated region fallthrough
CT: control target
= control target key end

     0   :  { %10 = vsyncpa [#allocation3], 0  ;;  %s472_s0 = inlined_call_operand.hbm [shape: bf16[8,32], index: 0, kind: input, shape index: {}]   ;;  %s473_s1 = inlined_call_operand.hbm [shape: bf16[32,128], index: 1, kind: input, shape index: {}]   ;;  %s474_s2 = inlined_call_operand.vmem [shape: f32[1,128], index: 2, kind: input, shape index: {}]   ;;  %s475_s3 = inlined_call_operand.hbm [shape: bf16[128,128], index: 3, kind: input, shape index: {}]   ;;  %s476_s4 = inlined_call_operand.vmem [shape: f32[1,128], index: 4, kind: input, shape index: {}]   ;;  %s477_s5 = inlined_call_operand.hbm [shape: f32[8,128], index: 5, kind: output, shape index: {}]  }
   0x1   :  { %11 = vsyncpa [#allocation6], 0 }
   0x2   :  { %12 = vsyncpa [#allocation4], 0  ;;  %s416_s18 = smov [#allocation5]  }
   0x3   :  { %s28_s19 = sshll.u32 %s416_s18, 4  ;;  %s29_s19 = int_to_ptr.vmem [resolvable:$true] %s28_s19 }
   0x4   :  { %s338_s20 = scalar_lea.vmem %s29_s19, 256  ;;  %p343_p1 = scmp.lt.s32.totalorder %s29_s19, %s29_s19 }
   0x5   :  { %p339_p0 = scmp.ne.s32.totalorder %s29_s19, %s338_s20  ;;  %p344_p2 = scmp.lt.s32.totalorder %s338_s20, %s338_s20 }
   0x7   :  { %p345_p3 = por %p344_p2, %p343_p1 }
   0x9   :  { %p346_p4 = pnand %p345_p3, %p339_p0 }
   0xb   :  { %349 = shalt.err (!%p346_p4)
}
   0xc   :  { %s417_s21 = smov 64   ;;  %s418_s22 = smov 4  }
   0xd   :  { %34 = dma.hbm_to_vmem [thread:$0]  %s473_s1, 256, %s29_s19, [#allocation6], %s417_s21, %s417_s21, %s418_s22  }
   0xe   :  { %s419_s25 = smov [#allocation2]   ;;  %s420_s27 = smov [#allocation7]  }
   0xf   :  { %s19_s26 = sshll.u32 %s419_s25, 4  ;;  %s42_s28 = sshll.u32 %s420_s27, 4  ;;  %s20_s26 = int_to_ptr.vmem [resolvable:$true] %s19_s26  ;;  %s43_s28 = int_to_ptr.vmem [resolvable:$true] %s42_s28 }
  0x10   :  { %s358_s29 = scalar_lea.vmem %s20_s26, 64  ;;  %p363_p6 = scmp.lt.s32.totalorder %s20_s26, %s20_s26 }
  0x11   :  { %p359_p5 = scmp.ne.s32.totalorder %s20_s26, %s358_s29  ;;  %p364_p7 = scmp.lt.s32.totalorder %s358_s29, %s358_s29 }
  0x13   :  { %p365_p8 = por %p364_p7, %p363_p6 }
  0x15   :  { %p366_p9 = pnand %p365_p8, %p359_p5 }
  0x17   :  { %369 = shalt.err (!%p366_p9)
}
  0x18   :  { %22 = dma.hbm_to_vmem [thread:$0]  %s472_s0, 64, %s20_s26, [#allocation3]  }
  0x19   :  { %s378_s7 = scalar_lea.vmem %s43_s28, 1024  ;;  %p383_p11 = scmp.lt.s32.totalorder %s43_s28, %s43_s28 }
  0x1a   :  { %p379_p10 = scmp.ne.s32.totalorder %s43_s28, %s378_s7  ;;  %p384_p12 = scmp.lt.s32.totalorder %s378_s7, %s378_s7 }
  0x1c   :  { %p385_p13 = por %p384_p12, %p383_p11 }
  0x1e   :  { %p386_p0 = pnand %p385_p13, %p379_p10 }
  0x20   :  { %389 = shalt.err (!%p386_p0)
}
  0x21   :  { %48 = dma.hbm_to_vmem [thread:$0]  %s475_s3, 1024, %s43_s28, [#allocation6], %s417_s21, %s417_s21, %s418_s22  }
  0x22   :  { %410 = dma.done.wait [#allocation3], 64  }
  0x23   :  { %411 = vsyncadd [#allocation3], 4294967232 }
  0x24   :  { %412 = dma.done.wait [#allocation6], 1280  }
  0x25   :  { %413 = vsyncadd [#allocation6], 4294966016  ;;  %v421_v0 = vmov 0.0   ;;  %vm422_vm0 = vmmov 0   ;;  %v320_v1 = vld [vmem:[#allocation5 + $0x8] sm:$0xff]   ;;  %v321_v2 = vld [vmem:[#allocation5] sm:$0xff]  }
  0x26   :  { %284 = vmatprep.subr.bf16.mxu0 %v421_v0  ;;  %288 = vmatprep.mubr.msk.bf16.mxu0 %vm422_vm0, %v421_v0  ;;  %v322_v3 = vld [vmem:[#allocation7 + $0x38] sm:$0xff]   ;;  %vm85_vm1 = vcmask 261120   ;;  %v323_v4 = vld [vmem:[#allocation7 + $0x30] sm:$0xff]   ;;  %v61_v5 = vld [vmem:[#allocation2] sm:$0xf]  ;;  %s423_s11 = smov [#allocation8]  }
  0x27   :  { %292 = vmatprep.subr.bf16.mxu1 %v421_v0  ;;  %308 = vmatprep.mubr.msk.bf16.mxu1 %vm422_vm0, %v421_v0  ;;  %v324_v6 = vld [vmem:[#allocation7 + $0x28] sm:$0xff]   ;;  %v325_v7 = vld [vmem:[#allocation7 + $0x20] sm:$0xff]   ;;  %v326_v8 = vld [vmem:[#allocation7 + $0x18] sm:$0xff]   ;;  %s249_s12 = sshll.u32 %s423_s11, 4  ;;  %s250_s12 = int_to_ptr.vmem [resolvable:$true] %s249_s12 }
  0x28   :  { %285 = vmatpush3.bf16.msra.mxu0 %v320_v1  ;;  %293 = vmatpush3.bf16.msra.mxu1 %v322_v3  ;;  %v327_v9 = vld [vmem:[#allocation7 + $0x10] sm:$0xff]   ;;  %v328_v10 = vld [vmem:[#allocation7 + $0x8] sm:$0xff]   ;;  %v329_v11 = vld [vmem:[#allocation7] sm:$0xff]   ;;  %p395_p2 = scmp.lt.s32.totalorder %s250_s12, %s250_s12 }
  0x29   :  { %286 = vmatprep.subr.bf16.mxu0 %v421_v0  ;;  %294 = vmatprep.subr.bf16.mxu1 %v421_v0  ;;  %v259_v12 = vld [vmem:[%s474_s2] ss:$0 sm:$0xff]  ;;  %s390_s2 = scalar_lea.vmem %s250_s12, 128 }
  0x2a   :  { %v263_v20 = vld [vmem:[%s476_s4] ss:$0 sm:$0xff]  ;;  %p391_p1 = scmp.ne.s32.totalorder %s250_s12, %s390_s2  ;;  %p396_p3 = scmp.lt.s32.totalorder %s390_s2, %s390_s2 }
  0x2c   :  { %287 = vmatpush3.bf16.msra.mxu0 %v321_v2  ;;  %295 = vmatpush3.bf16.msra.mxu1 %v323_v4  ;;  %p397_p4 = por %p396_p3, %p395_p2 }
  0x2d   :  { %296 = vmatprep.subr.bf16.mxu1 %v421_v0 }
  0x2e   :  { %p398_p5 = pnand %p397_p4, %p391_p1 }
  0x2f   :  { %289 = vmatmul.mubr.msk.bf16.vlgmr.msra.gmra.mxu0 %vm85_vm1, %v61_v5 }
  0x30   :  { %297 = vmatpush3.bf16.msra.mxu1 %v324_v6 }
  0x31   :  { %298 = vmatprep.subr.bf16.mxu1 %v421_v0 }
  0x34   :  { %299 = vmatpush3.bf16.msra.mxu1 %v325_v7 }
  0x35   :  { %300 = vmatprep.subr.bf16.mxu1 %v421_v0 }
  0x38   :  { %301 = vmatpush3.bf16.msra.mxu1 %v326_v8 }
  0x39   :  { %302 = vmatprep.subr.bf16.mxu1 %v421_v0 }
  0x3c   :  { %303 = vmatpush3.bf16.msra.mxu1 %v327_v9 }
  0x3d   :  { %304 = vmatprep.subr.bf16.mxu1 %v421_v0 }
  0x40   :  { %305 = vmatpush3.bf16.msra.mxu1 %v328_v10 }
  0x41   :  { %306 = vmatprep.subr.bf16.mxu1 %v421_v0 }
  0x44   :  { %307 = vmatpush3.bf16.msra.mxu1 %v329_v11 }
  0xef   :  { %v123_v13 = vpop.f32.mrf.mxu0 }
  0xf0   :  { %v124_v14 = vadd.f32 %v259_v12, %v123_v13 }
  0xf1   :  { %v290_v15 = vpop.f32.mrf.mxu0 }
  0xf2   :  { %v129_v16 = vmax.f32 %v124_v14, 0.0 }
  0xf3   :  { %v126_v17 = vpop.f32.mrf.mxu0 }
  0xf4   :  { %v130_v18 = vpack.c.bf16 %v129_v16, %v129_v16 }
  0xf5   :  { %v291_v19 = vpop.f32.mrf.mxu0 }
  0xf6   :  { %309 = vmatmul.mubr.bf16.vlgmr.msra.gmra.mxu1 %v130_v18 }
 0x1b6   :  { %v236_v21 = vpop.f32.mrf.mxu1 }
 0x1b7   :  { %v237_v22 = vadd.f32 %v263_v20, %v236_v21 }
 0x1b8   :  { %v310_v23 = vpop.f32.mrf.mxu1 }
 0x1b9   :  { %242 = vst [vmem:[#allocation8] sm:$0xff] %v237_v22 }
 0x1ba   :  { %v239_v24 = vpop.f32.mrf.mxu1 }
 0x1bb   :  { %401 = shalt.err (!%p398_p5)
}
 0x1bc   :  { %252 = dma.vmem_to_hbm [thread:$0]  %s250_s12, 128, %s477_s5, [#allocation4]   ;;  %v311_v25 = vpop.f32.mrf.mxu1 }
 0x1bd   :  { %414 = dma.done.wait [#allocation4], 128  }
 0x1be   :  { %415 = vsyncadd [#allocation4], 4294967168 }
 0x1bf   :  { %256 = vsyncpa [#allocation3], 1 }
 0x1c0   :  { %257 = vsyncpa [#allocation6], 1 }
 0x1c1   :  { %258 = vsyncpa [#allocation4], 1 }

</bundles_post_ra>
